<compile_context>
chip_gen: v5e
topology: v5e:2x2
jax: 0.10.0
libtpu: 0.0.40
codegen_flags: <defaults>
</compile_context>

<pallas_src>
import math

import jax
import jax.numpy as jnp
import numpy as np
from jax import lax
from jax.experimental import pallas as pl
from jax.experimental.pallas import tpu as pltpu


def _round_up(a, b):
    return ((a + b - 1) // b) * b


def _tensorcores_per_chip():
    """2 on megacore parts (v7x / v4 / v5p), 1 on v5e / v6e.  Correctness holds either way."""
    try:
        kind = jax.devices()[0].device_kind.lower()
    except Exception:
        return 1
    if any(tag in kind for tag in ("v7", "v4", "v5p")):
        return 2
    return 1


def _make_focal_kernel(alpha, gamma, tile_rows, rows_valid, need_row_mask):
    def focal_loss_kernel(preds_ref, tgt_ref, expand_ref, clsid_ref,
                          loss_out_ref, pos_out_ref,
                          loss_acc, pos_acc):
        step = pl.program_id(1)

        @pl.when(step == 0)
        def _init():
            loss_acc[...] = jnp.zeros_like(loss_acc)
            pos_acc[...] = jnp.zeros_like(pos_acc)

        x = preds_ref[...].astype(jnp.float32)                 # (T, L) logits
        # Expand each anchor's scalar label across its C lanes with a constant 0/1
        # matmul on the otherwise-idle MXU (bf16 inputs, f32 accumulation).
        tgt_exp = jnp.dot(tgt_ref[...], expand_ref[...],
                          preferred_element_type=jnp.float32)  # (T, L)
        class_ids = clsid_ref[...]                             # (1, L): 1..C pattern

        t_pos = tgt_exp == class_ids       # one-hot positive lane (label == class k)
        keep = tgt_exp > -1.0              # anchor not ignored / not fold padding
        if need_row_mask:
            # Grid-overhang rows (no HBM padding): mask via the static row limit.
            row_start = (pl.program_id(0) * pl.num_programs(1) + step) * tile_rows
            row_ids = lax.broadcasted_iota(jnp.int32, x.shape, 0) + row_start
            in_bounds = row_ids < rows_valid
            keep = jnp.logical_and(keep, in_bounds)
            t_pos = jnp.logical_and(t_pos, in_bounds)

        # Signed logit folds the t==1 / t==0 branches into one transcendental chain:
        #   bce     = softplus(s) = max(s, 0) + log1p(exp(-|s|))
        #   1 - p_t = sigmoid(s)  = exp(min(s, 0) - log1p(exp(-|s|)))
        # -> EUP ops: exp, log1p, exp; no reciprocal / Newton refinement on the VALU.
        s = jnp.where(t_pos, -x, x)
        e = jnp.exp(-jnp.abs(x))                       # == exp(-|s|)
        log1p_e = jnp.log1p(e)
        bce = jnp.maximum(s, 0.0) + log1p_e
        focal_w = jnp.exp(jnp.minimum(s, 0.0) - log1p_e)

        if gamma == 2:
            fw = focal_w * focal_w
        elif gamma == 1:
            fw = focal_w
        elif gamma == 0:
            fw = jnp.ones_like(focal_w)
        else:
            # TODO(synk): non-integer gamma falls back to pow; 0**gamma lowering for
            # fully saturated logits has not been validated on TPU.
            fw = focal_w ** gamma

        if alpha is None:
            wl = fw * bce
        else:
            alpha_w = jnp.where(t_pos, jnp.float32(alpha), jnp.float32(1.0 - alpha))
            wl = fw * alpha_w * bce

        fl = jnp.where(keep, wl, 0.0)          # drop ignored / padded / overhang
        pos = jnp.where(t_pos, 1.0, 0.0)       # exactly one hot lane per positive

        # Elementwise accumulation into resident (8, L) buffers.  The reshape splits
        # the row dim on an 8-sublane boundary, so the axis-0 sum lowers to vadds.
        tr, lanes = fl.shape
        loss_acc[...] += jnp.sum(fl.reshape(tr // 8, 8, lanes), axis=0)
        pos_acc[...] += jnp.sum(pos.reshape(tr // 8, 8, lanes), axis=0)

        @pl.when(step == pl.num_programs(1) - 1)
        def _finalize():
            # Sublane reduce only; keep the store lane-dense.  The cross-lane sum and
            # the normalisation live in the JAX epilogue.
            loss_out_ref[...] = jnp.sum(loss_acc[...], axis=0, keepdims=True)
            pos_out_ref[...] = jnp.sum(pos_acc[...], axis=0, keepdims=True)

    return focal_loss_kernel


def focal_loss_forward(loc_preds, loc_targets, cls_preds, cls_targets,
                       alpha=0.25, gamma=2, tile_rows=2048, num_cores=None):
    """Matches FocalLoss.forward: loc_* are accepted but unused (as in the module)."""
    del loc_preds, loc_targets  # forward() never uses them
    batch_size, num_anchors, num_classes = cls_preds.shape
    n = batch_size * num_anchors
    c = num_classes

    if num_cores is None:
        num_cores = _tensorcores_per_chip()
    num_cores = max(1, int(num_cores))

    # Lane-dense folding: pack `fold` anchors per row so fold*C is a multiple of 128.
    fold = math.lcm(c, 128) // c
    lanes = fold * c
    if lanes > 2048:              # pathological class counts: fall back to no folding
        fold, lanes = 1, c

    # bf16 labels are exact integers for C <= 256 -> single-pass bf16 MXU expand.
    tgt_dtype = jnp.bfloat16 if c <= 256 else jnp.float32

    tgts1d = jnp.reshape(cls_targets, (n,)).astype(tgt_dtype)
    rem = (-n) % fold
    if rem:
        # TODO(synk): only when #anchors isn't a multiple of the lane fold do we pay a
        # pad copy; typical detection shapes take the free-reshape path below.
        preds2d = jnp.pad(jnp.reshape(cls_preds, (n, c)), ((0, rem), (0, 0)))
        tgts1d = jnp.pad(tgts1d, (0, rem), constant_values=-1)
    else:
        preds2d = jnp.reshape(cls_preds, (n, c))        # native dtype (bf16 OK)
    rows = (n + rem) // fold
    preds_lanes = jnp.reshape(preds2d, (rows, lanes))   # layout-preserving reshape
    tgts_fold = jnp.reshape(tgts1d, (rows, fold))

    # Tile rows: full extent for small inputs (always layout-legal), otherwise a
    # multiple of 32 (legal sublane packing for f32/bf16/int8) with overhang masked
    # in-kernel instead of padding HBM.
    tile_rows = int(tile_rows)
    if rows <= tile_rows and rows % 8 == 0:
        tile_rows = rows
    else:
        tile_rows = _round_up(min(tile_rows, rows), 32)

    steps = -(-rows // (num_cores * tile_rows))
    need_row_mask = (num_cores * steps * tile_rows) != rows
    last_block = -(-rows // tile_rows) - 1     # clamp so no DMA starts out of bounds

    def row_block(cc, i):
        return (jnp.minimum(cc * steps + i, last_block), 0)

    # Tiny compile-time constants: target-expansion matrix and per-lane class ids.
    lane_idx = np.arange(lanes)
    expand = (lane_idx[None, :] // c == np.arange(fold)[:, None]).astype(np.float32)
    class_ids = ((lane_idx % c) + 1).astype(np.float32)[None, :]
    expand = jnp.asarray(expand, dtype=tgt_dtype)
    class_ids = jnp.asarray(class_ids)

    gamma_static = int(gamma) if float(gamma).is_integer() else float(gamma)
    kernel = _make_focal_kernel(alpha, gamma_static, tile_rows, rows, need_row_mask)

    loss_parts, pos_parts = pl.pallas_call(
        kernel,
        out_shape=(jax.ShapeDtypeStruct((num_cores, lanes), jnp.float32),
                   jax.ShapeDtypeStruct((num_cores, lanes), jnp.float32)),
        grid_spec=pltpu.PrefetchScalarGridSpec(
            num_scalar_prefetch=0,
            grid=(num_cores, steps),
            in_specs=[
                pl.BlockSpec((tile_rows, lanes), row_block),
                pl.BlockSpec((tile_rows, fold), row_block),
                pl.BlockSpec((fold, lanes), lambda cc, i: (0, 0)),
                pl.BlockSpec((1, lanes), lambda cc, i: (0, 0)),
            ],
            out_specs=[
                pl.BlockSpec((1, lanes), lambda cc, i: (cc, 0)),
                pl.BlockSpec((1, lanes), lambda cc, i: (cc, 0)),
            ],
            scratch_shapes=[pltpu.VMEM((8, lanes), jnp.float32),
                            pltpu.VMEM((8, lanes), jnp.float32)],
        ),
        compiler_params=pltpu.CompilerParams(
            dimension_semantics=("parallel", "arbitrary"),
            vmem_limit_bytes=32 * 1024 * 1024,
        ),
    )(preds_lanes, tgts_fold, expand, class_ids)

    # Trivial JAX epilogue: combine per-core/per-lane partials and normalize ('sum').
    total = jnp.sum(loss_parts)
    num_pos = jnp.sum(pos_parts)
    denom = jnp.where(num_pos > 0.0, num_pos, jnp.float32(batch_size))
    return total / denom


def _reference_forward(cls_preds, cls_targets, alpha=0.25, gamma=2):
    """Pure-JAX reference mirroring the PyTorch semantics (mask-and-sum form)."""
    b, a, c = cls_preds.shape
    x = jnp.reshape(cls_preds, (-1, c)).astype(jnp.float32)
    lab = jnp.reshape(cls_targets, (-1,)).astype(jnp.float32)
    valid = (lab > -1.0)[:, None]
    num_pos = jnp.sum((lab > 0.0).astype(jnp.float32))
    t = (lab[:, None] == (jnp.arange(c, dtype=jnp.float32)[None, :] + 1.0)).astype(jnp.float32)
    bce = jnp.maximum(x, 0.0) - x * t + jnp.log1p(jnp.exp(-jnp.abs(x)))
    p = jax.nn.sigmoid(x)
    aw = jnp.where(t == 1.0, alpha, 1.0 - alpha)
    fw = (1.0 - jnp.where(t == 1.0, p, 1.0 - p)) ** gamma
    total = jnp.sum(jnp.where(valid, fw * aw * bce, 0.0))
    denom = jnp.where(num_pos > 0, num_pos, jnp.float32(b))
    return total / denom


if __name__ == "__main__":
    key = jax.random.PRNGKey(0)
    k1, k2, k3, k4 = jax.random.split(key, 4)

    batch, anchors, num_classes = 2, 64, 8  # N = 128 anchors, 8 classes

    loc_preds = jax.random.normal(k1, (batch, anchors, 4), dtype=jnp.float32)
    loc_targets = jax.random.normal(k2, (batch, anchors, 4), dtype=jnp.float32)
    cls_preds = jax.random.normal(k3, (batch, anchors, num_classes), dtype=jnp.float32)
    # labels in {-1 (ignore), 0 (background), 1..num_classes}
    cls_targets = jax.random.randint(k4, (batch, anchors), -1, num_classes + 1).astype(jnp.float32)

    loss = focal_loss_forward(loc_preds, loc_targets, cls_preds, cls_targets)
    loss = jax.block_until_ready(loss)

    ref = _reference_forward(cls_preds, cls_targets)
    assert jnp.allclose(loss, ref, rtol=1e-4, atol=1e-5), (loss, ref)

    print("KERNEL_OK")
</pallas_src>

<mosaic_0001>
module attributes {stable_mosaic.version = 11 : i64} {
  func.func @focal_loss_kernel(%arg0: i32, %arg1: i32, %arg2: memref<8x128xf32, #tpu.memory_space<vmem>>, %arg3: memref<8x16xbf16, #tpu.memory_space<vmem>>, %arg4: memref<16x128xbf16, #tpu.memory_space<vmem>>, %arg5: memref<1x128xf32, #tpu.memory_space<vmem>>, %arg6: memref<1x128xf32, #tpu.memory_space<vmem>>, %arg7: memref<1x128xf32, #tpu.memory_space<vmem>>, %arg8: memref<8x128xf32, #tpu.memory_space<vmem>>, %arg9: memref<8x128xf32, #tpu.memory_space<vmem>>) attributes {dimension_semantics = [#tpu.dimension_semantics<parallel>, #tpu.dimension_semantics<arbitrary>], iteration_bounds = array<i64: 1, 1>, scalar_prefetch = 0 : i64, scratch_operands = 2 : i64, tpu.core_type = #tpu.core_type<tc>, window_params = [{transform_indices = @transform_0, window_bounds = array<i64: 8, 128>}, {transform_indices = @transform_1, window_bounds = array<i64: 8, 16>}, {pipeline_mode = #tpu.pipeline_mode<synchronous>, transform_indices = @transform_2, window_bounds = array<i64: 16, 128>}, {pipeline_mode = #tpu.pipeline_mode<synchronous>, transform_indices = @transform_3, window_bounds = array<i64: 1, 128>}, {transform_indices = @transform_4, window_bounds = array<i64: 1, 128>}, {transform_indices = @transform_5, window_bounds = array<i64: 1, 128>}]} {
    %c0_i32 = arith.constant 0 : i32
    %0 = arith.cmpi eq, %arg1, %c0_i32 : i32
    %1 = arith.extui %0 : i1 to i32
    %c0_i32_0 = arith.constant 0 : i32
    %2 = arith.cmpi ne, %1, %c0_i32_0 : i32
    scf.if %2 {
      %cst_30 = arith.constant 0.000000e+00 : f32
      %51 = vector.broadcast %cst_30 : f32 to vector<8x128xf32>
      %c0_31 = arith.constant 0 : index
      %c0_32 = arith.constant 0 : index
      %52 = vector.load %arg8[%c0_31, %c0_32] : memref<8x128xf32, #tpu.memory_space<vmem>>, vector<8x128xf32>
      tpu.vector_store %arg8[%c0_31, %c0_32], %51 {strides = array<i32>} : memref<8x128xf32, #tpu.memory_space<vmem>>, vector<8x128xf32>,
      %cst_33 = arith.constant 0.000000e+00 : f32
      %53 = vector.broadcast %cst_33 : f32 to vector<8x128xf32>
      %c0_34 = arith.constant 0 : index
      %c0_35 = arith.constant 0 : index
      %54 = vector.load %arg9[%c0_34, %c0_35] : memref<8x128xf32, #tpu.memory_space<vmem>>, vector<8x128xf32>
      tpu.vector_store %arg9[%c0_34, %c0_35], %53 {strides = array<i32>} : memref<8x128xf32, #tpu.memory_space<vmem>>, vector<8x128xf32>,
    } else {
    }
    %c0 = arith.constant 0 : index
    %c0_1 = arith.constant 0 : index
    %3 = vector.load %arg2[%c0, %c0_1] : memref<8x128xf32, #tpu.memory_space<vmem>>, vector<8x128xf32>
    %c0_2 = arith.constant 0 : index
    %c0_3 = arith.constant 0 : index
    %4 = vector.load %arg3[%c0_2, %c0_3] : memref<8x16xbf16, #tpu.memory_space<vmem>>, vector<8x16xbf16>
    %c0_4 = arith.constant 0 : index
    %c0_5 = arith.constant 0 : index
    %5 = vector.load %arg4[%c0_4, %c0_5] : memref<16x128xbf16, #tpu.memory_space<vmem>>, vector<16x128xbf16>
    %cst = arith.constant dense<0.000000e+00> : vector<8x128xf32>
    %6 = tpu.matmul %4, %5, %cst {dimension_numbers = #tpu.dot_dimension_numbers<[1], [0], [0], [1], [0, 0, 1, 1], [], []>} : vector<8x16xbf16>, vector<16x128xbf16>, vector<8x128xf32> -> vector<8x128xf32>
    %c0_6 = arith.constant 0 : index
    %c0_7 = arith.constant 0 : index
    %7 = vector.load %arg5[%c0_6, %c0_7] : memref<1x128xf32, #tpu.memory_space<vmem>>, vector<1x128xf32>
    %8 = vector.broadcast %7 : vector<1x128xf32> to vector<8x128xf32>
    %9 = arith.cmpf oeq, %6, %8 : vector<8x128xf32>
    %cst_8 = arith.constant -1.000000e+00 : f32
    %10 = vector.broadcast %cst_8 : f32 to vector<8x128xf32>
    %11 = arith.cmpf ogt, %6, %10 : vector<8x128xf32>
    %cst_9 = arith.constant 0.000000e+00 : f32
    %12 = vector.broadcast %cst_9 : f32 to vector<8x128xf32>
    %13 = arith.subf %12, %3 : vector<8x128xf32>
    %14 = arith.select %9, %13, %3 : vector<8x128xi1>, vector<8x128xf32>
    %15 = math.absf %3 : vector<8x128xf32>
    %cst_10 = arith.constant 0.000000e+00 : f32
    %16 = vector.broadcast %cst_10 : f32 to vector<8x128xf32>
    %17 = arith.subf %16, %15 : vector<8x128xf32>
    %18 = math.exp %17 : vector<8x128xf32>
    %19 = math.log1p %18 : vector<8x128xf32>
    %cst_11 = arith.constant 0.000000e+00 : f32
    %20 = vector.broadcast %cst_11 : f32 to vector<8x128xf32>
    %21 = arith.maximumf %14, %20 : vector<8x128xf32>
    %22 = arith.addf %21, %19 : vector<8x128xf32>
    %cst_12 = arith.constant 0.000000e+00 : f32
    %23 = vector.broadcast %cst_12 : f32 to vector<8x128xf32>
    %24 = arith.minimumf %14, %23 : vector<8x128xf32>
    %25 = arith.subf %24, %19 : vector<8x128xf32>
    %26 = math.exp %25 : vector<8x128xf32>
    %27 = arith.mulf %26, %26 : vector<8x128xf32>
    %cst_13 = arith.constant 2.500000e-01 : f32
    %cst_14 = arith.constant 7.500000e-01 : f32
    %28 = vector.broadcast %cst_13 : f32 to vector<8x128xf32>
    %29 = vector.broadcast %cst_14 : f32 to vector<8x128xf32>
    %30 = arith.select %9, %28, %29 : vector<8x128xi1>, vector<8x128xf32>
    %31 = arith.mulf %27, %30 : vector<8x128xf32>
    %32 = arith.mulf %31, %22 : vector<8x128xf32>
    %cst_15 = arith.constant 0.000000e+00 : f32
    %33 = vector.broadcast %cst_15 : f32 to vector<8x128xf32>
    %34 = arith.select %11, %32, %33 : vector<8x128xi1>, vector<8x128xf32>
    %cst_16 = arith.constant 1.000000e+00 : f32
    %cst_17 = arith.constant 0.000000e+00 : f32
    %35 = vector.broadcast %cst_16 : f32 to vector<8x128xf32>
    %36 = vector.broadcast %cst_17 : f32 to vector<8x128xf32>
    %37 = arith.select %9, %35, %36 : vector<8x128xi1>, vector<8x128xf32>
    %c0_18 = arith.constant 0 : index
    %c0_19 = arith.constant 0 : index
    %38 = vector.load %arg8[%c0_18, %c0_19] : memref<8x128xf32, #tpu.memory_space<vmem>>, vector<8x128xf32>
    %39 = vector.shape_cast %34 : vector<8x128xf32> to vector<1x8x128xf32>
    %cst_20 = arith.constant dense<0.000000e+00> : vector<8x128xf32>
    %40 = vector.multi_reduction <add>, %39, %cst_20 [0] : vector<1x8x128xf32> to vector<8x128xf32>
    %41 = arith.addf %38, %40 : vector<8x128xf32>
    %c0_21 = arith.constant 0 : index
    %c0_22 = arith.constant 0 : index
    %42 = vector.load %arg8[%c0_21, %c0_22] : memref<8x128xf32, #tpu.memory_space<vmem>>, vector<8x128xf32>
    tpu.vector_store %arg8[%c0_21, %c0_22], %41 {strides = array<i32>} : memref<8x128xf32, #tpu.memory_space<vmem>>, vector<8x128xf32>,
    %c0_23 = arith.constant 0 : index
    %c0_24 = arith.constant 0 : index
    %43 = vector.load %arg9[%c0_23, %c0_24] : memref<8x128xf32, #tpu.memory_space<vmem>>, vector<8x128xf32>
    %44 = vector.shape_cast %37 : vector<8x128xf32> to vector<1x8x128xf32>
    %cst_25 = arith.constant dense<0.000000e+00> : vector<8x128xf32>
    %45 = vector.multi_reduction <add>, %44, %cst_25 [0] : vector<1x8x128xf32> to vector<8x128xf32>
    %46 = arith.addf %43, %45 : vector<8x128xf32>
    %c0_26 = arith.constant 0 : index
    %c0_27 = arith.constant 0 : index
    %47 = vector.load %arg9[%c0_26, %c0_27] : memref<8x128xf32, #tpu.memory_space<vmem>>, vector<8x128xf32>
    tpu.vector_store %arg9[%c0_26, %c0_27], %46 {strides = array<i32>} : memref<8x128xf32, #tpu.memory_space<vmem>>, vector<8x128xf32>,
    %c0_i32_28 = arith.constant 0 : i32
    %48 = arith.cmpi eq, %arg1, %c0_i32_28 : i32
    %49 = arith.extui %48 : i1 to i32
    %c0_i32_29 = arith.constant 0 : i32
    %50 = arith.cmpi ne, %49, %c0_i32_29 : i32
    scf.if %50 {
      %c0_30 = arith.constant 0 : index
      %c0_31 = arith.constant 0 : index
      %51 = vector.load %arg8[%c0_30, %c0_31] : memref<8x128xf32, #tpu.memory_space<vmem>>, vector<8x128xf32>
      %cst_32 = arith.constant dense<0.000000e+00> : vector<128xf32>
      %52 = vector.multi_reduction <add>, %51, %cst_32 [0] : vector<8x128xf32> to vector<128xf32>
      %53 = vector.shape_cast %52 : vector<128xf32> to vector<1x128xf32>
      %c0_33 = arith.constant 0 : index
      %c0_34 = arith.constant 0 : index
      %54 = vector.load %arg6[%c0_33, %c0_34] : memref<1x128xf32, #tpu.memory_space<vmem>>, vector<1x128xf32>
      tpu.vector_store %arg6[%c0_33, %c0_34], %53 {strides = array<i32>} : memref<1x128xf32, #tpu.memory_space<vmem>>, vector<1x128xf32>,
      %c0_35 = arith.constant 0 : index
      %c0_36 = arith.constant 0 : index
      %55 = vector.load %arg9[%c0_35, %c0_36] : memref<8x128xf32, #tpu.memory_space<vmem>>, vector<8x128xf32>
      %cst_37 = arith.constant dense<0.000000e+00> : vector<128xf32>
      %56 = vector.multi_reduction <add>, %55, %cst_37 [0] : vector<8x128xf32> to vector<128xf32>
      %57 = vector.shape_cast %56 : vector<128xf32> to vector<1x128xf32>
      %c0_38 = arith.constant 0 : index
      %c0_39 = arith.constant 0 : index
      %58 = vector.load %arg7[%c0_38, %c0_39] : memref<1x128xf32, #tpu.memory_space<vmem>>, vector<1x128xf32>
      tpu.vector_store %arg7[%c0_38, %c0_39], %57 {strides = array<i32>} : memref<1x128xf32, #tpu.memory_space<vmem>>, vector<1x128xf32>,
    } else {
    }
    return
  }
  func.func @transform_0(%arg0: i32, %arg1: i32) -> (i32, i32) {
    %c1_i32 = arith.constant 1 : i32
    %0 = arith.muli %arg0, %c1_i32 : i32
    %1 = arith.addi %0, %arg1 : i32
    %c0_i32 = arith.constant 0 : i32
    %2 = arith.minsi %1, %c0_i32 : i32
    %c0_i32_0 = arith.constant 0 : i32
    %c0_i32_1 = arith.constant 0 : i32
    return %2, %c0_i32_0 : i32, i32
  }
  func.func @transform_1(%arg0: i32, %arg1: i32) -> (i32, i32) {
    %c1_i32 = arith.constant 1 : i32
    %0 = arith.muli %arg0, %c1_i32 : i32
    %1 = arith.addi %0, %arg1 : i32
    %c0_i32 = arith.constant 0 : i32
    %2 = arith.minsi %1, %c0_i32 : i32
    %c0_i32_0 = arith.constant 0 : i32
    %c0_i32_1 = arith.constant 0 : i32
    return %2, %c0_i32_0 : i32, i32
  }
  func.func @transform_2(%arg0: i32, %arg1: i32) -> (i32, i32) {
    %c0_i32 = arith.constant 0 : i32
    %c0_i32_0 = arith.constant 0 : i32
    %c0_i32_1 = arith.constant 0 : i32
    return %c0_i32, %c0_i32_0 : i32, i32
  }
  func.func @transform_3(%arg0: i32, %arg1: i32) -> (i32, i32) {
    %c0_i32 = arith.constant 0 : i32
    %c0_i32_0 = arith.constant 0 : i32
    %c0_i32_1 = arith.constant 0 : i32
    return %c0_i32, %c0_i32_0 : i32, i32
  }
  func.func @transform_4(%arg0: i32, %arg1: i32) -> (i32, i32) {
    %c0_i32 = arith.constant 0 : i32
    %c0_i32_0 = arith.constant 0 : i32
    return %arg0, %c0_i32 : i32, i32
  }
  func.func @transform_5(%arg0: i32, %arg1: i32) -> (i32, i32) {
    %c0_i32 = arith.constant 0 : i32
    %c0_i32_0 = arith.constant 0 : i32
    return %arg0, %c0_i32 : i32, i32
  }
}

</mosaic_0001>

<bundles_post_ra>
// kernel: tpu_custom_call.1
= control target key start
LH: loop header
LB: loop body
LE: loop exit
PB: predicated region body
PF: predicated region fallthrough
CT: control target
= control target key end

     0   :  { %11 = vsyncpa [#allocation5], 0  ;;  %s422_s0 = inlined_call_operand.hbm [shape: f32[8,128], index: 0, kind: input, shape index: {}]   ;;  %s423_s1 = inlined_call_operand.hbm [shape: bf16[8,16], index: 1, kind: input, shape index: {}]   ;;  %s424_s2 = inlined_call_operand.hbm [shape: bf16[16,128], index: 2, kind: input, shape index: {}]   ;;  %s425_s3 = inlined_call_operand.vmem [shape: f32[1,128], index: 3, kind: input, shape index: {}]   ;;  %s426_s4 = inlined_call_operand.hbm [shape: f32[1,128], index: 4, kind: output, shape index: {0}]   ;;  %s427_s5 = inlined_call_operand.hbm [shape: f32[1,128], index: 5, kind: output, shape index: {1}]  }
   0x1   :  { %12 = vsyncpa [#allocation8], 0 }
   0x2   :  { %13 = vsyncpa [#allocation6], 0  ;;  %s41_s20 = sshll.u32 %s423_s1, 4  ;;  %s42_s20 = int_to_ptr.hbm [resolvable:$true] %s41_s20 }
   0x3   :  { %14 = vsyncpa [#allocation12], 0  ;;  %s362_s21 = smov [#allocation7]   ;;  %s25_s25 = sshll.u32 %s422_s0, 4  ;;  %s26_s25 = int_to_ptr.hbm [resolvable:$true] %s25_s25 }
   0x4   :  { %s43_s22 = sshll.u32 %s362_s21, 4  ;;  %s363_s26 = smov [#allocation4]   ;;  %s44_s22 = int_to_ptr.vmem [resolvable:$true] %s43_s22 }
   0x5   :  { %46 = dma.hbm_to_vmem [thread:$0]  %s42_s20, 64, %s44_s22, [#allocation8]  }
   0x6   :  { %s27_s27 = sshll.u32 %s363_s26, 4  ;;  %s51_s30 = sshll.u32 %s424_s2, 4  ;;  %s28_s27 = int_to_ptr.vmem [resolvable:$true] %s27_s27  ;;  %s52_s30 = int_to_ptr.hbm [resolvable:$true] %s51_s30 }
   0x7   :  { %30 = dma.hbm_to_vmem [thread:$0]  %s26_s25, 128, %s28_s27, [#allocation5]  }
   0x8   :  { %s364_s1 = smov [#allocation9]   ;;  %s365_s7 = smov 64  }
   0x9   :  { %s53_s6 = sshll.u32 %s364_s1, 4  ;;  %s366_s8 = smov 4   ;;  %s54_s6 = int_to_ptr.vmem [resolvable:$true] %s53_s6 }
   0xa   :  { %59 = dma.hbm_to_vmem [thread:$0]  %s52_s30, 128, %s54_s6, [#allocation8], %s365_s7, %s365_s7, %s366_s8  }
   0xb   :  { %354 = dma.done.wait [#allocation5], 128  }
   0xc   :  { %355 = vsyncadd [#allocation5], 4294967168 }
   0xd   :  { %356 = dma.done.wait [#allocation8], 192  }
   0xe   :  { %357 = vsyncadd [#allocation8], 4294967104  ;;  %v217_v0 = vld [vmem:[#allocation9] sm:$0xff]  ;;  %v88_v1 = vld [vmem:[#allocation7] sm:$0xf]  ;;  %vm97_vm0 = vcmask 130048  }
   0xf   :  { %108 = vmatpush.bf16.msra.mxu0 %v217_v0  ;;  %v87_v2 = vld [vmem:[#allocation4] sm:$0xff]  ;;  %v367_v19 = vmov 0.0   ;;  %s192_s12 = sshll.u32 %s427_s5, 4  ;;  %v369_v34 = vmov 0.75   ;;  %s370_s5 = smov [#allocation10]   ;;  %s193_s12 = int_to_ptr.hbm [resolvable:$true] %s192_s12 }
  0x10   :  { %v122_v3 = vand.u32 2147483647, %v87_v2  ;;  %v227_v12 = vld [vmem:[%s425_s3] ss:$0 sm:$0xff]  ;;  %v120_v13 = vsub.f32 0.0, %v87_v2  ;;  %s368_s3 = smov [#allocation11]  }
  0x11   :  { %s190_s9 = sshll.u32 %s368_s3, 4  ;;  %s179_s13 = sshll.u32 %s370_s5, 4  ;;  %s191_s9 = int_to_ptr.vmem [resolvable:$true] %s190_s9  ;;  %s180_s13 = int_to_ptr.vmem [resolvable:$true] %s179_s13 }
  0x12   :  { %216 = vmatmul.msk.bf16.vlgmr.msra.gmra.mxu0 %vm97_vm0, %v88_v1  ;;  %v123_v4 = vsub.f32 0.0, %v122_v3  ;;  %s181_s16 = sshll.u32 %s426_s4, 4  ;;  %s182_s16 = int_to_ptr.hbm [resolvable:$true] %s181_s16 }
  0x14   :  { %v124_v5 = vmul.f32 1.442695, %v123_v4 }
  0x16   :  { %228 = vpow2.f32 %v124_v5 }
  0x1c   :  { %v229_v6 = vpop.eup %228 }
  0x1d   :  { %v126_v7 = vadd.f32 1.0, %v229_v6  ;;  %v129_v8 = vmul.f32 -0.5, %v229_v6  ;;  %v132_v11 = vand.u32 2147483647, %v229_v6 }
  0x1f   :  { %230 = vlog2.f32 %v126_v7  ;;  %v130_v9 = vadd.f32 1.0, %v129_v8  ;;  %vm133_vm1 = vcmp.lt.f32.partialorder %v132_v11, 0.0004427343 }
  0x21   :  { %v131_v15 = vmul.f32 %v229_v6, %v130_v9 }
  0x25   :  { %v231_v10 = vpop.eup %230 }
  0x26   :  { %v128_v14 = vmul.f32 0.6931472, %v231_v10 }
  0x28   :  { %v134_v18 = vsel %vm133_vm1, %v131_v15, %v128_v14 }
  0x8f   :  { %v110_v16 = vpop.f32.mrf.mxu0 }
  0x90   :  { %vm118_vm2 = vcmp.eq.f32.partialorder %v110_v16, %v227_v12  ;;  %vm119_vm3 = vcmp.gt.f32.partialorder %v110_v16, -1.0 }
  0x91   :  { %v121_v17 = vsel %vm118_vm2, %v120_v13, %v87_v2  ;;  %v146_v20 = vsel %vm118_vm2, 1.0, %v367_v19  ;;  %v142_v35 = vsel %vm118_vm2, 0.25, %v369_v34 }
  0x92   :  { %v137_v21 = vmin.f32 %v121_v17, 0.0  ;;  %v167_v22 = vrot.slane %v146_v20, 4  ;;  %v135_v31 = vmax.f32 %v121_v17, 0.0 }
  0x94   :  { %v138_v23 = vsub.f32 %v137_v21, %v134_v18  ;;  %v168_v24 = vadd.f32 %v167_v22, %v146_v20  ;;  %v136_v36 = vadd.f32 %v135_v31, %v134_v18 }
  0x96   :  { %v139_v25 = vmul.f32 1.442695, %v138_v23  ;;  %v169_v26 = vrot.slane %v168_v24, 2 }
  0x97   :  { %v112_v27 = vpop.f32.mrf.mxu0 }
  0x98   :  { %232 = vpow2.f32 %v139_v25  ;;  %v170_v28 = vadd.f32 %v169_v26, %v168_v24 }
  0x9a   :  { %v171_v29 = vrot.slane %v170_v28, 1 }
  0x9c   :  { %v172_v30 = vadd.f32 %v171_v29, %v170_v28 }
  0x9e   :  { %v233_v32 = vpop.eup %232  ;;  %173 = vst [vmem:[#allocation11] sm:$0x1] %v172_v30 }
  0x9f   :  { %v141_v33 = vmul.f32 %v233_v32, %v233_v32  ;;  %195 = dma.vmem_to_hbm [thread:$0]  %s191_s9, 16, %s193_s12, [#allocation12]  }
  0xa1   :  { %v143_v37 = vmul.f32 %v142_v35, %v141_v33 }
  0xa3   :  { %v144_v38 = vmul.f32 %v143_v37, %v136_v36 }
  0xa5   :  { %v145_v39 = vsel %vm119_vm3, %v144_v38, 0.0 }
  0xa6   :  { %v159_v40 = vrot.slane %v145_v39, 4 }
  0xa8   :  { %v160_v41 = vadd.f32 %v159_v40, %v145_v39 }
  0xaa   :  { %v161_v42 = vrot.slane %v160_v41, 2 }
  0xac   :  { %v162_v43 = vadd.f32 %v161_v42, %v160_v41 }
  0xae   :  { %v163_v44 = vrot.slane %v162_v43, 1 }
  0xb0   :  { %v164_v45 = vadd.f32 %v163_v44, %v162_v43 }
  0xb2   :  { %165 = vst [vmem:[#allocation10] sm:$0x1] %v164_v45 }
  0xb3   :  { %184 = dma.vmem_to_hbm [thread:$0]  %s180_s13, 16, %s182_s16, [#allocation6]  }
  0xb4   :  { %358 = dma.done.wait [#allocation6], 16  }
  0xb5   :  { %359 = vsyncadd [#allocation6], 4294967280 }
  0xb6   :  { %360 = dma.done.wait [#allocation12], 16  }
  0xb7   :  { %361 = vsyncadd [#allocation12], 4294967280 }
  0xb8   :  { %204 = vsyncpa [#allocation5], 1 }
  0xb9   :  { %205 = vsyncpa [#allocation8], 1 }
  0xba   :  { %206 = vsyncpa [#allocation6], 1 }
  0xbb   :  { %207 = vsyncpa [#allocation12], 1 }

</bundles_post_ra>
